<compile_context>
chip_gen: v7x
topology: tpu7x:2x2x1
jax: 0.10.0
libtpu: 0.0.40
codegen_flags: <defaults>
</compile_context>

<pallas_src>
import jax
import jax.numpy as jnp
from jax import lax
from jax.experimental import pallas as pl
from jax.experimental.pallas import tpu as pltpu


def _round_up(x, m):
    return (x + m - 1) // m * m


def _composed_conv_kernel(w_ref, b_ref, p_ref, o_ref):
    # w_ref: (C_out_pad, K_pad)  composed 9x9 conv weights, im2col-flattened
    # b_ref: (C_out_pad, 1)      composed bias
    # p_ref: (K_pad, TM)         lane-dense im2col patch tile
    # o_ref: (C_out_pad, TM)     lane-dense output tile (unmasked stores)
    y = jnp.dot(w_ref[...], p_ref[...], preferred_element_type=jnp.float32)
    o_ref[...] = (y + b_ref[...]).astype(o_ref.dtype)


def my_network_pallas(x, w1, b1, w2, b2):
    """Conv2d(3,5,5) o Conv2d(5,10,5) (valid, NCHW/OIHW) as ONE composed conv."""
    orig_dtype = x.dtype
    N, C_in, H, W = x.shape
    C1, _, K1h, K1w = w1.shape
    C2 = w2.shape[0]
    KH, KW = K1h + w2.shape[2] - 1, K1w + w2.shape[3] - 1   # 9, 9
    Ho, Wo = H - KH + 1, W - KW + 1                         # 8, 8

    x = x.astype(jnp.float32)
    w1 = w1.astype(jnp.float32)
    b1 = b1.astype(jnp.float32)
    w2 = w2.astype(jnp.float32)
    b2 = b2.astype(jnp.float32)

    # ---- compose the two convolutions (tiny, done once by XLA) -------------
    # W[o,c,a,b] = sum_{m,i,j} w2[o,m,a-i,b-j] * w1[m,c,i,j]
    w1_flip = w1[:, :, ::-1, ::-1]
    w_comp = lax.conv_general_dilated(
        w2,                                        # (C2, C1, 5, 5) as NCHW
        jnp.transpose(w1_flip, (1, 0, 2, 3)),      # (C_in, C1, 5, 5) as OIHW
        window_strides=(1, 1),
        padding=[(K1h - 1, K1h - 1), (K1w - 1, K1w - 1)],
        dimension_numbers=("NCHW", "OIHW", "NCHW"),
        precision=lax.Precision.HIGHEST)           # -> (C2, C_in, 9, 9)
    b_comp = b2 + jnp.einsum("omuv,m->o", w2, b1,
                             precision=lax.Precision.HIGHEST)

    # ---- lane-dense im2col in the wrapper (layout plumbing, not compute) ----
    K = C_in * KH * KW                             # 243
    M = N * Ho * Wo                                # 128 for N=2
    K_pad = _round_up(K, 128)                      # 256: lane-dense weights, full sublane groups
    M_pad = _round_up(M, 128)

    taps = []
    for a in range(KH):
        for b in range(KW):
            taps.append(x[:, :, a:a + Ho, b:b + Wo])        # (N, C_in, Ho, Wo)
    p = jnp.stack(taps, axis=2)                             # (N, C_in, KH*KW, Ho, Wo)
    p = jnp.transpose(p, (1, 2, 0, 3, 4)).reshape(K, M)     # k = c*81 + a*9 + b
    p = jnp.pad(p, ((0, K_pad - K), (0, M_pad - M)))

    C2P = _round_up(C2, 8)                         # pad C_out to full sublanes
    w_mat = w_comp.reshape(C2, K)
    w_mat = jnp.pad(w_mat, ((0, C2P - C2), (0, K_pad - K)))
    b_col = jnp.pad(b_comp, (0, C2P - C2))[:, None]          # (C2P, 1)

    # ---- one matmul-only Pallas kernel, tiled over M (parallel axis) --------
    TM = max(t for t in (1024, 512, 256, 128) if M_pad % t == 0)
    grid = (M_pad // TM,)

    out = pl.pallas_call(
        _composed_conv_kernel,
        out_shape=jax.ShapeDtypeStruct((C2P, M_pad), jnp.float32),
        grid=grid,
        in_specs=[
            pl.BlockSpec((C2P, K_pad), lambda i: (0, 0)),   # weights (revisited)
            pl.BlockSpec((C2P, 1), lambda i: (0, 0)),       # bias (revisited)
            pl.BlockSpec((K_pad, TM), lambda i: (0, i)),    # patch tile
        ],
        out_specs=pl.BlockSpec((C2P, TM), lambda i: (0, i)),
        compiler_params=pltpu.CompilerParams(
            dimension_semantics=("parallel",)),             # megacore shards M
    )(w_mat, b_col, p)

    # Drop padding, restore NCHW.
    out = out[:C2, :M].reshape(C2, N, Ho, Wo)
    return jnp.transpose(out, (1, 0, 2, 3)).astype(orig_dtype)


def init_params(key):
    """Deterministic init matching nn.Conv2d shapes (kaiming-uniform-like)."""
    k1, k2, k3, k4 = jax.random.split(key, 4)

    # net_1: Conv2d(3, 5, 5)  -> weight (5, 3, 5, 5), bias (5,)
    fan_in1 = 3 * 5 * 5
    bound1 = 1.0 / jnp.sqrt(fan_in1)
    w1 = jax.random.uniform(k1, (5, 3, 5, 5), jnp.float32, -bound1, bound1)
    b1 = jax.random.uniform(k2, (5,), jnp.float32, -bound1, bound1)

    # net_2: Conv2d(5, 10, 5) -> weight (10, 5, 5, 5), bias (10,)
    fan_in2 = 5 * 5 * 5
    bound2 = 1.0 / jnp.sqrt(fan_in2)
    w2 = jax.random.uniform(k3, (10, 5, 5, 5), jnp.float32, -bound2, bound2)
    b2 = jax.random.uniform(k4, (10,), jnp.float32, -bound2, bound2)

    return (w1, b1), (w2, b2)


@jax.jit
def my_network_forward(x, w1, b1, w2, b2):
    return my_network_pallas(x, w1, b1, w2, b2)   # (N, 10, H-8, W-8)


def reference_forward(x, w1, b1, w2, b2):
    """Plain-JAX reference (two sequential convs) for correctness checking."""
    def conv(x, w, b):
        y = lax.conv_general_dilated(
            x, w, window_strides=(1, 1), padding="VALID",
            dimension_numbers=("NCHW", "OIHW", "NCHW"),
            precision=lax.Precision.HIGHEST)
        return y + b.reshape(1, -1, 1, 1)
    return conv(conv(x, w1, b1), w2, b2)


if __name__ == "__main__":
    key = jax.random.PRNGKey(0)
    kx, kp = jax.random.split(key)

    # Small input consistent with Conv2d(3, ...): N=2, C=3, H=W=16
    x = jax.random.normal(kx, (2, 3, 16, 16), jnp.float32)
    (w1, b1), (w2, b2) = init_params(kp)

    out = my_network_forward(x, w1, b1, w2, b2)
    out = jax.block_until_ready(out)

    ref = reference_forward(x, w1, b1, w2, b2)
    assert out.shape == (2, 10, 8, 8), out.shape
    assert jnp.allclose(out, ref, atol=2e-4, rtol=2e-4), "mismatch vs reference"

    print("KERNEL_OK")
</pallas_src>

<mosaic_0001>
module attributes {stable_mosaic.version = 11 : i64} {
  func.func @_composed_conv_kernel(%arg0: i32, %arg1: memref<16x256xf32, #tpu.memory_space<vmem>>, %arg2: memref<16x1xf32, #tpu.memory_space<vmem>>, %arg3: memref<256x128xf32, #tpu.memory_space<vmem>>, %arg4: memref<16x128xf32, #tpu.memory_space<vmem>>) attributes {dimension_semantics = [#tpu.dimension_semantics<parallel>], iteration_bounds = array<i64: 1>, scalar_prefetch = 0 : i64, scratch_operands = 0 : i64, tpu.core_type = #tpu.core_type<tc>, window_params = [{pipeline_mode = #tpu.pipeline_mode<synchronous>, transform_indices = @transform_0, window_bounds = array<i64: 16, 256>}, {pipeline_mode = #tpu.pipeline_mode<synchronous>, transform_indices = @transform_1, window_bounds = array<i64: 16, 1>}, {transform_indices = @transform_2, window_bounds = array<i64: 256, 128>}, {transform_indices = @transform_3, window_bounds = array<i64: 16, 128>}]} {
    %c0 = arith.constant 0 : index
    %c0_0 = arith.constant 0 : index
    %0 = vector.load %arg1[%c0, %c0_0] : memref<16x256xf32, #tpu.memory_space<vmem>>, vector<16x256xf32>
    %c0_1 = arith.constant 0 : index
    %c0_2 = arith.constant 0 : index
    %1 = vector.load %arg3[%c0_1, %c0_2] : memref<256x128xf32, #tpu.memory_space<vmem>>, vector<256x128xf32>
    %cst = arith.constant dense<0.000000e+00> : vector<16x128xf32>
    %2 = tpu.matmul %0, %1, %cst {dimension_numbers = #tpu.dot_dimension_numbers<[1], [0], [0], [1], [0, 0, 1, 1], [], []>} : vector<16x256xf32>, vector<256x128xf32>, vector<16x128xf32> -> vector<16x128xf32>
    %c0_3 = arith.constant 0 : index
    %c0_4 = arith.constant 0 : index
    %3 = vector.load %arg2[%c0_3, %c0_4] : memref<16x1xf32, #tpu.memory_space<vmem>>, vector<16x1xf32>
    %4 = vector.broadcast %3 : vector<16x1xf32> to vector<16x128xf32>
    %5 = arith.addf %2, %4 : vector<16x128xf32>
    %c0_5 = arith.constant 0 : index
    %c0_6 = arith.constant 0 : index
    %6 = vector.load %arg4[%c0_5, %c0_6] : memref<16x128xf32, #tpu.memory_space<vmem>>, vector<16x128xf32>
    tpu.vector_store %arg4[%c0_5, %c0_6], %5 {strides = array<i32>} : memref<16x128xf32, #tpu.memory_space<vmem>>, vector<16x128xf32>,
    return
  }
  func.func @transform_0(%arg0: i32) -> (i32, i32) {
    %c0_i32 = arith.constant 0 : i32
    %c0_i32_0 = arith.constant 0 : i32
    %c0_i32_1 = arith.constant 0 : i32
    return %c0_i32, %c0_i32_0 : i32, i32
  }
  func.func @transform_1(%arg0: i32) -> (i32, i32) {
    %c0_i32 = arith.constant 0 : i32
    %c0_i32_0 = arith.constant 0 : i32
    %c0_i32_1 = arith.constant 0 : i32
    return %c0_i32, %c0_i32_0 : i32, i32
  }
  func.func @transform_2(%arg0: i32) -> (i32, i32) {
    %c0_i32 = arith.constant 0 : i32
    %c0_i32_0 = arith.constant 0 : i32
    return %c0_i32, %arg0 : i32, i32
  }
  func.func @transform_3(%arg0: i32) -> (i32, i32) {
    %c0_i32 = arith.constant 0 : i32
    %c0_i32_0 = arith.constant 0 : i32
    return %c0_i32, %arg0 : i32, i32
  }
}

</mosaic_0001>

<bundles_post_ra>
// kernel: my_network_forward.1
= control target key start
LH: loop header
LB: loop body
LE: loop exit
PB: predicated region body
PF: predicated region fallthrough
CT: control target
= control target key end

     0   :  { %v231_v3 = vmov 0   ;;  %s372_s2 = inlined_call_operand.vmem [shape: f32[256,128], index: 2, kind: input, shape index: {}]   ;;  %s373_s0 = inlined_call_operand.vmem [shape: f32[16,256], index: 0, kind: input, shape index: {}]   ;;  %s374_s1 = inlined_call_operand.vmem [shape: f32[16,1], index: 1, kind: input, shape index: {}]   ;;  %s375_s3 = inlined_call_operand.vmem [shape: f32[16,128], index: 3, kind: output, shape index: {}]  }
   0x1   :  { %v34_v0 = vld [vmem:[%s372_s2 + $0x80] sm:$0xff]  ;;  %v35_v1 = vld [vmem:[%s372_s2 + $0x88] sm:$0xff]  ;;  %230 = vset.pattern.permute.xlu0 %v231_v3  ;;  %v36_v6 = vld [vmem:[%s372_s2 + $0x90] sm:$0xff] }
   0x2   :  { %v18_v2 = vld [vmem:[%s372_s2] sm:$0xff]  ;;  %v181_v4 = vpack.c.bf16 %v35_v1, %v34_v0  ;;  %v19_v5 = vld [vmem:[%s372_s2 + $0x8] sm:$0xff]  ;;  %v37_v7 = vld [vmem:[%s372_s2 + $0x98] sm:$0xff] }
   0x3   :  { %v183_v8 = vpack.c.bf16 %v19_v5, %v18_v2  ;;  %v185_v9 = vpack.c.bf16 %v37_v7, %v36_v6  ;;  %v20_v10 = vld [vmem:[%s372_s2 + $0x10] sm:$0xff]  ;;  %v21_v11 = vld [vmem:[%s372_s2 + $0x18] sm:$0xff]  ;;  %v38_v12 = vld [vmem:[%s372_s2 + $0xa0] sm:$0xff] }
   0x4   :  { %182 = vmatprep.subr.bf16.mxu0 %v181_v4  ;;  %213 = vmatprep.subr.bf16.mxu1 %v181_v4  ;;  %v39_v13 = vld [vmem:[%s372_s2 + $0xa8] sm:$0xff]  ;;  %v187_v14 = vpack.c.bf16 %v21_v11, %v20_v10  ;;  %v22_v16 = vld [vmem:[%s372_s2 + $0x20] sm:$0xff]  ;;  %v40_v18 = vld [vmem:[%s372_s2 + $0xb0] sm:$0xff] }
   0x5   :  { %184 = vmatpush3.bf16.msra.mxu0 %v183_v8  ;;  %221 = vmatpush3.bf16.msra.mxu1 %v183_v8  ;;  %v189_v15 = vpack.c.bf16 %v39_v13, %v38_v12  ;;  %v23_v17 = vld [vmem:[%s372_s2 + $0x28] sm:$0xff]  ;;  %v41_v19 = vld [vmem:[%s372_s2 + $0xb8] sm:$0xff]  ;;  %v24_v22 = vld [vmem:[%s372_s2 + $0x30] sm:$0xff] }
   0x6   :  { %186 = vmatprep.subr.bf16.mxu0 %v185_v9  ;;  %214 = vmatprep.subr.bf16.mxu1 %v185_v9  ;;  %v191_v20 = vpack.c.bf16 %v23_v17, %v22_v16  ;;  %v193_v21 = vpack.c.bf16 %v41_v19, %v40_v18  ;;  %v25_v23 = vld [vmem:[%s372_s2 + $0x38] sm:$0xff]  ;;  %v42_v24 = vld [vmem:[%s372_s2 + $0xc0] sm:$0xff]  ;;  %v43_v25 = vld [vmem:[%s372_s2 + $0xc8] sm:$0xff] }
   0x7   :  { %v15_v26 = vld [vmem:[%s373_s0 + $0x8] sm:$0xff]  ;;  %v17_v27 = vld [vmem:[%s373_s0 + $0x18] sm:$0xff]  ;;  %v195_v28 = vpack.c.bf16 %v25_v23, %v24_v22  ;;  %v50_v29 = vld [vmem:[%s374_s1] sm:$0xff]  ;;  %v197_v30 = vpack.c.bf16 %v43_v25, %v42_v24 }
   0x8   :  { %126 = vmatprep.mubr.f32.mxu0 %v15_v26  ;;  %v26_v31 = vld [vmem:[%s372_s2 + $0x40] sm:$0xff]  ;;  %v27_v32 = vld [vmem:[%s372_s2 + $0x48] sm:$0xff]  ;;  %v44_v33 = vld [vmem:[%s372_s2 + $0xd0] sm:$0xff]  ;;  %131 = vmatprep.mubr.f32.mxu1 %v17_v27 }
   0x9   :  { %188 = vmatpush3.bf16.msra.mxu0 %v187_v14  ;;  %222 = vmatpush3.bf16.msra.mxu1 %v187_v14  ;;  %v45_v34 = vld [vmem:[%s372_s2 + $0xd8] sm:$0xff]  ;;  %v51_v35 = vld [vmem:[%s374_s1 + $0x8] sm:$0xff]  ;;  %v199_v36 = vpack.c.bf16 %v27_v32, %v26_v31  ;;  %v28_v38 = vld [vmem:[%s372_s2 + $0x50] sm:$0xff] }
   0xa   :  { %190 = vmatprep.subr.bf16.mxu0 %v189_v15  ;;  %215 = vmatprep.subr.bf16.mxu1 %v189_v15  ;;  %v201_v37 = vpack.c.bf16 %v45_v34, %v44_v33  ;;  %v29_v39 = vld [vmem:[%s372_s2 + $0x58] sm:$0xff]  ;;  %v46_v40 = vld [vmem:[%s372_s2 + $0xe0] sm:$0xff]  ;;  %v47_v41 = vld [vmem:[%s372_s2 + $0xe8] sm:$0xff] }
   0xb   :  { %54 = vperm.xlu0 %230, %v50_v29   ;;  %v203_v42 = vpack.c.bf16 %v29_v39, %v28_v38  ;;  %v205_v43 = vpack.c.bf16 %v47_v41, %v46_v40  ;;  %v30_v44 = vld [vmem:[%s372_s2 + $0x60] sm:$0xff]  ;;  %v31_v45 = vld [vmem:[%s372_s2 + $0x68] sm:$0xff]  ;;  %v48_v46 = vld [vmem:[%s372_s2 + $0xf0] sm:$0xff] }
   0xc   :  { %v49_v47 = vld [vmem:[%s372_s2 + $0xf8] sm:$0xff]  ;;  %v207_v48 = vpack.c.bf16 %v31_v45, %v30_v44  ;;  %v32_v50 = vld [vmem:[%s372_s2 + $0x70] sm:$0xff]  ;;  %v14_v53 = vld [vmem:[%s373_s0] sm:$0xff] }
   0xd   :  { %192 = vmatpush3.bf16.msra.mxu0 %v191_v20  ;;  %223 = vmatpush3.bf16.msra.mxu1 %v191_v20  ;;  %v209_v49 = vpack.c.bf16 %v49_v47, %v48_v46  ;;  %v33_v51 = vld [vmem:[%s372_s2 + $0x78] sm:$0xff]  ;;  %v16_v54 = vld [vmem:[%s373_s0 + $0x10] sm:$0xff] }
   0xe   :  { %194 = vmatprep.subr.bf16.mxu0 %v193_v21  ;;  %216 = vmatprep.subr.bf16.mxu1 %v193_v21  ;;  %v211_v52 = vpack.c.bf16 %v33_v51, %v32_v50 }
   0xf   :  { %59 = vperm.xlu0 %230, %v51_v35  }
  0x11   :  { %196 = vmatpush3.bf16.msra.mxu0 %v195_v28  ;;  %224 = vmatpush3.bf16.msra.mxu1 %v195_v28 }
  0x12   :  { %198 = vmatprep.subr.bf16.mxu0 %v197_v30  ;;  %217 = vmatprep.subr.bf16.mxu1 %v197_v30 }
  0x15   :  { %200 = vmatpush3.bf16.msra.mxu0 %v199_v36  ;;  %225 = vmatpush3.bf16.msra.mxu1 %v199_v36 }
  0x16   :  { %202 = vmatprep.subr.bf16.mxu0 %v201_v37  ;;  %218 = vmatprep.subr.bf16.mxu1 %v201_v37 }
  0x19   :  { %204 = vmatpush3.bf16.msra.mxu0 %v203_v42  ;;  %226 = vmatpush3.bf16.msra.mxu1 %v203_v42 }
  0x1a   :  { %206 = vmatprep.subr.bf16.mxu0 %v205_v43  ;;  %219 = vmatprep.subr.bf16.mxu1 %v205_v43 }
  0x1d   :  { %208 = vmatpush3.bf16.msra.mxu0 %v207_v48  ;;  %227 = vmatpush3.bf16.msra.mxu1 %v207_v48 }
  0x1e   :  { %210 = vmatprep.subr.bf16.mxu0 %v209_v49  ;;  %220 = vmatprep.subr.bf16.mxu1 %v209_v49 }
  0x21   :  { %212 = vmatpush3.bf16.msra.mxu0 %v211_v52  ;;  %228 = vmatpush3.bf16.msra.mxu1 %v211_v52 }
  0x24   :  { %127 = vmatmul.mubr.f32.vlgmr.msra.gmra.mrb[0].mxu0 %v14_v53  ;;  %132 = vmatmul.mubr.f32.vlgmr.msra.gmra.mrb[0].mxu1 %v16_v54 }
  0x8a   :  { %v55_v55 = vpop.permute.xlu0 %54 }
  0x8e   :  { %v60_v62 = vpop.permute.xlu0 %59 }
  0xf7   :  { %v175_v56 = vpop.f32.mrb[0].mxu0  ;;  %v178_v57 = vpop.f32.mrb[0].mxu1 }
  0xf8   :  { %v176_v58 = vpop.f32.mrb[1].mxu0  ;;  %v179_v59 = vpop.f32.mrb[1].mxu1 }
  0xf9   :  { %v177_v60 = vadd.f32 %v176_v58, %v175_v56  ;;  %v180_v61 = vadd.f32 %v179_v59, %v178_v57 }
  0xfb   :  { %v129_v63 = vadd.f32 %v177_v60, %v55_v55  ;;  %v134_v0 = vadd.f32 %v180_v61, %v60_v62 }
  0xfd   :  { %137 = vst [vmem:[%s375_s3] sm:$0xff] %v129_v63  ;;  %138 = vst [vmem:[%s375_s3 + $0x8] sm:$0xff] %v134_v0 }

</bundles_post_ra>
